<compile_context>
chip_gen: v7x
topology: tpu7x:2x2x1
jax: 0.10.0
libtpu: 0.0.40
codegen_flags: <defaults>
</compile_context>

<pallas_src>
import jax
import jax.numpy as jnp
from jax.experimental import pallas as pl
from jax.experimental.pallas import tpu as pltpu

_LANE = 128
_SUBLANE = 16  # valid sublane multiple for both f32 (8) and bf16 (16)


def _round_up(x, m):
    return ((x + m - 1) // m) * m


def _vmem_capacity_bytes():
    """Generation-aware VMEM capacity (64 MiB on v7x, 128 MiB on v5e/v6e)."""
    try:
        return int(pltpu.get_tpu_info().vmem_capacity_bytes)
    except Exception:
        return 64 * 1024 * 1024  # conservative fallback (v7x per-core)


def _make_mlp_kernel(num_layers, compute_dtype):
    """num_layers = nb_layer hidden (Linear+ReLU) layers + 1 final Linear."""

    def kernel(*refs):
        # refs = (x_tile, W0, b0, ..., W_{L-1}, b_{L-1}, out_tile)
        x_ref = refs[0]
        out_ref = refs[-1]
        params = refs[1:-1]

        h = x_ref[...].astype(compute_dtype)
        # Hidden layers: Linear (MXU, f32 accumulation) + bias/ReLU in f32.
        for i in range(num_layers - 1):
            w = params[2 * i][...]
            b = params[2 * i + 1][...]  # f32
            y = jnp.dot(h, w, preferred_element_type=jnp.float32) + b
            h = jnp.maximum(y, 0.0).astype(compute_dtype)
        # Embedding layer: Linear, no activation, narrow (emb_dim) output.
        w = params[-2][...]
        b = params[-1][...]
        out_ref[...] = (jnp.dot(h, w, preferred_element_type=jnp.float32)
                        + b).astype(out_ref.dtype)

    return kernel


def prepare_params(mean, std, weights, biases, compute_dtype=jnp.bfloat16):
    """One-time parameter prep (fold normalization + pad hidden dims).

    weights[i]: (in, out), biases[i]: (out,).
    Returns flat list [W0, b0, W1, b1, ...] with:
      * W0:     (input_dim, h_pad)   compute_dtype   (in-dim stays narrow)
      * Wi:     (h_pad, h_pad)       compute_dtype
      * W_last: (h_pad, emb_dim)     compute_dtype   (out-dim stays narrow)
      * biases: (1, padded_out)      float32         (bias add done in f32)
    Normalization ((x - mean) / (std + 1e-9)) is folded into W0 / b0.
    """
    eps = jnp.float32(1e-9)
    mean32 = mean.astype(jnp.float32)
    inv_std = 1.0 / (std.astype(jnp.float32) + eps)
    w0 = weights[0].astype(jnp.float32)
    b0 = biases[0].astype(jnp.float32)
    ws = [w0 * inv_std[:, None]] + [w.astype(jnp.float32) for w in weights[1:]]
    bs = [b0 - (mean32 * inv_std) @ w0] + [b.astype(jnp.float32)
                                           for b in biases[1:]]

    num_layers = len(ws)
    flat = []
    for li, (w, b) in enumerate(zip(ws, bs)):
        d_in, d_out = w.shape
        # Keep layer 0's in-dim narrow (raw hits features, no lane padding).
        pi = d_in if li == 0 else _round_up(d_in, _LANE)
        # Keep the final layer's out-dim narrow (narrow HBM writeback).
        po = _round_up(d_out, _LANE) if li < num_layers - 1 else d_out
        wp = jnp.zeros((pi, po), jnp.float32).at[:d_in, :d_out].set(w)
        bp = jnp.zeros((1, po), jnp.float32).at[0, :d_out].set(b)
        flat.append(wp.astype(compute_dtype))
        flat.append(bp)  # stays f32
    return flat


def mlp_forward(hits, params, emb_dim, *, compute_dtype=jnp.bfloat16,
                tile_n=4096):
    """MLP forward pass as a batch-tiled Pallas TPU kernel.

    hits:   (N, input_dim) float array (raw, un-normalized).
    params: output of prepare_params() (weights compute_dtype, biases f32).
    """
    n, d = hits.shape
    num_layers = len(params) // 2
    x_dtype = compute_dtype
    x_bytes = jnp.dtype(x_dtype).itemsize
    h_pad = params[0].shape[1]

    # ---- Generation-aware VMEM budget -> cap on tile_n ----
    param_bytes = sum(int(p.size) * jnp.dtype(p.dtype).itemsize
                      for p in params)
    # double-buffered in/out tiles + num_layers f32 live intermediates
    per_row = (2 * d * x_bytes + 2 * emb_dim * 4
               + (num_layers + 2) * h_pad * 4)
    fixed = 2 * param_bytes + (2 << 20)  # params (2x bufs) + Mosaic scratch
    budget = int(0.75 * _vmem_capacity_bytes())
    max_tile = max(_SUBLANE,
                   (max(budget - fixed, per_row * _SUBLANE) // per_row)
                   // _SUBLANE * _SUBLANE)
    tile_n = min(tile_n, max_tile)
    # For large batches keep >= 4 grid steps so the "parallel" axis feeds
    # both v7x TensorCores (and the pipeline stays warm).
    if n >= 4096:
        tile_n = min(tile_n, _round_up(pl.cdiv(n, 4), _SUBLANE))
    tile_n = max(_SUBLANE,
                 _round_up(min(tile_n, _round_up(n, _SUBLANE)), _SUBLANE))
    n_pad = _round_up(n, tile_n)

    # ---- Only batch padding (narrow feature dim stays narrow in HBM) ----
    x = hits.astype(x_dtype)
    if n_pad != n:
        x = jnp.zeros((n_pad, d), x_dtype).at[:n].set(x)

    grid = (n_pad // tile_n,)
    x_spec = pl.BlockSpec((tile_n, d), lambda i: (i, 0))
    param_specs = [pl.BlockSpec(p.shape, lambda i: (0, 0)) for p in params]
    out_spec = pl.BlockSpec((tile_n, emb_dim), lambda i: (i, 0))

    # ---- Advisory cost estimate ----
    flops = sum(2 * n_pad * params[2 * li].shape[0] * params[2 * li].shape[1]
                for li in range(num_layers))
    bytes_accessed = n_pad * (d * x_bytes + emb_dim * 4) + param_bytes
    cost = pl.CostEstimate(flops=int(flops), transcendentals=0,
                           bytes_accessed=int(bytes_accessed))

    vmem_need = fixed + per_row * tile_n
    vmem_limit = int(min(max(vmem_need, 16 << 20), budget + (8 << 20)))

    out = pl.pallas_call(
        _make_mlp_kernel(num_layers, compute_dtype),
        out_shape=jax.ShapeDtypeStruct((n_pad, emb_dim), jnp.float32),
        grid=grid,
        in_specs=[x_spec] + param_specs,
        out_specs=out_spec,
        compiler_params=pltpu.CompilerParams(
            dimension_semantics=("parallel",),
            vmem_limit_bytes=vmem_limit),
        cost_estimate=cost,
    )(x, *params)

    return out[:n]


def init_params(key, nb_hidden, nb_layer, input_dim, emb_dim):
    """Deterministic parameter init (same shapes as the PyTorch module)."""
    dims_in = [input_dim] + [nb_hidden] * nb_layer
    dims_out = [nb_hidden] * nb_layer + [emb_dim]
    weights, biases = [], []
    for d_in, d_out in zip(dims_in, dims_out):
        key, kw, kb = jax.random.split(key, 3)
        bound = 1.0 / jnp.sqrt(d_in)
        # stored as (in, out) -> kernel does x @ W + b (== PyTorch x @ W.T + b)
        weights.append(jax.random.uniform(kw, (d_in, d_out), jnp.float32,
                                          -bound, bound))
        biases.append(jax.random.uniform(kb, (d_out,), jnp.float32,
                                         -bound, bound))
    return weights, biases


def mlp_reference(hits, mean, std, weights, biases):
    """Plain-JAX reference matching the PyTorch module exactly."""
    h = (hits - mean[None, :]) / (std[None, :] + 1e-9)
    for w, b in zip(weights[:-1], biases[:-1]):
        h = jnp.maximum(h @ w + b[None, :], 0.0)
    return h @ weights[-1] + biases[-1][None, :]


if __name__ == "__main__":
    # Module-consistent small shapes: hits are (batch, input_dim) features.
    batch = 8
    input_dim = 3
    nb_hidden = 32
    nb_layer = 3
    emb_dim = 3

    key = jax.random.PRNGKey(0)
    key, k_hits, k_mean, k_std, k_params = jax.random.split(key, 5)

    hits = jax.random.normal(k_hits, (batch, input_dim), jnp.float32)
    mean = jax.random.normal(k_mean, (input_dim,), jnp.float32)
    std = jax.random.uniform(k_std, (input_dim,), jnp.float32, 0.5, 1.5)

    weights, biases = init_params(k_params, nb_hidden, nb_layer, input_dim,
                                  emb_dim)
    ref1 = mlp_reference(hits, mean, std, weights, biases)

    # Case 1: f32 compute path, single tile, tight tolerance.
    params_f32 = prepare_params(mean, std, weights, biases, jnp.float32)
    out1 = mlp_forward(hits, params_f32, emb_dim, compute_dtype=jnp.float32)
    out1 = jax.block_until_ready(out1)
    assert out1.shape == (batch, emb_dim)
    assert jnp.allclose(out1, ref1, atol=1e-4, rtol=1e-4), "mismatch (f32)"

    # Case 2: default bf16 MXU path, multi-tile grid with ragged batch
    # (exercises batch padding + grid + narrow in/out blocks).
    batch2 = 300
    key, k2 = jax.random.split(key)
    hits2 = jax.random.normal(k2, (batch2, input_dim), jnp.float32)
    ref2 = mlp_reference(hits2, mean, std, weights, biases)
    params_bf16 = prepare_params(mean, std, weights, biases, jnp.bfloat16)
    out2 = mlp_forward(hits2, params_bf16, emb_dim, tile_n=128)
    out2 = jax.block_until_ready(out2)
    assert out2.shape == (batch2, emb_dim)
    assert jnp.allclose(out2, ref2, atol=1e-1, rtol=5e-2), "mismatch (bf16)"

    print("KERNEL_OK")
</pallas_src>

<mosaic_0001>
module attributes {stable_mosaic.version = 11 : i64} {
  func.func @kernel(%arg0: i32, %arg1: memref<16x3xf32, #tpu.memory_space<vmem>>, %arg2: memref<3x128xf32, #tpu.memory_space<vmem>>, %arg3: memref<1x128xf32, #tpu.memory_space<vmem>>, %arg4: memref<128x128xf32, #tpu.memory_space<vmem>>, %arg5: memref<1x128xf32, #tpu.memory_space<vmem>>, %arg6: memref<128x128xf32, #tpu.memory_space<vmem>>, %arg7: memref<1x128xf32, #tpu.memory_space<vmem>>, %arg8: memref<128x3xf32, #tpu.memory_space<vmem>>, %arg9: memref<1x3xf32, #tpu.memory_space<vmem>>, %arg10: memref<16x3xf32, #tpu.memory_space<vmem>>) attributes {dimension_semantics = [#tpu.dimension_semantics<parallel>], iteration_bounds = array<i64: 1>, scalar_prefetch = 0 : i64, scratch_operands = 0 : i64, tpu.core_type = #tpu.core_type<tc>, window_params = [{transform_indices = @transform_0, window_bounds = array<i64: 16, 3>}, {pipeline_mode = #tpu.pipeline_mode<synchronous>, transform_indices = @transform_1, window_bounds = array<i64: 3, 128>}, {pipeline_mode = #tpu.pipeline_mode<synchronous>, transform_indices = @transform_2, window_bounds = array<i64: 1, 128>}, {pipeline_mode = #tpu.pipeline_mode<synchronous>, transform_indices = @transform_3, window_bounds = array<i64: 128, 128>}, {pipeline_mode = #tpu.pipeline_mode<synchronous>, transform_indices = @transform_4, window_bounds = array<i64: 1, 128>}, {pipeline_mode = #tpu.pipeline_mode<synchronous>, transform_indices = @transform_5, window_bounds = array<i64: 128, 128>}, {pipeline_mode = #tpu.pipeline_mode<synchronous>, transform_indices = @transform_6, window_bounds = array<i64: 1, 128>}, {pipeline_mode = #tpu.pipeline_mode<synchronous>, transform_indices = @transform_7, window_bounds = array<i64: 128, 3>}, {pipeline_mode = #tpu.pipeline_mode<synchronous>, transform_indices = @transform_8, window_bounds = array<i64: 1, 3>}, {transform_indices = @transform_9, window_bounds = array<i64: 16, 3>}]} {
    %c0 = arith.constant 0 : index
    %c0_0 = arith.constant 0 : index
    %0 = vector.load %arg1[%c0, %c0_0] : memref<16x3xf32, #tpu.memory_space<vmem>>, vector<16x3xf32>
    %c0_1 = arith.constant 0 : index
    %c0_2 = arith.constant 0 : index
    %1 = vector.load %arg2[%c0_1, %c0_2] : memref<3x128xf32, #tpu.memory_space<vmem>>, vector<3x128xf32>
    %c0_3 = arith.constant 0 : index
    %c0_4 = arith.constant 0 : index
    %2 = vector.load %arg3[%c0_3, %c0_4] : memref<1x128xf32, #tpu.memory_space<vmem>>, vector<1x128xf32>
    %cst = arith.constant dense<0.000000e+00> : vector<16x128xf32>
    %3 = tpu.matmul %0, %1, %cst {dimension_numbers = #tpu.dot_dimension_numbers<[1], [0], [0], [1], [0, 0, 1, 1], [], []>} : vector<16x3xf32>, vector<3x128xf32>, vector<16x128xf32> -> vector<16x128xf32>
    %4 = vector.broadcast %2 : vector<1x128xf32> to vector<16x128xf32>
    %5 = arith.addf %3, %4 : vector<16x128xf32>
    %cst_5 = arith.constant 0.000000e+00 : f32
    %6 = vector.broadcast %cst_5 : f32 to vector<16x128xf32>
    %7 = arith.maximumf %5, %6 : vector<16x128xf32>
    %c0_6 = arith.constant 0 : index
    %c0_7 = arith.constant 0 : index
    %8 = vector.load %arg4[%c0_6, %c0_7] : memref<128x128xf32, #tpu.memory_space<vmem>>, vector<128x128xf32>
    %c0_8 = arith.constant 0 : index
    %c0_9 = arith.constant 0 : index
    %9 = vector.load %arg5[%c0_8, %c0_9] : memref<1x128xf32, #tpu.memory_space<vmem>>, vector<1x128xf32>
    %cst_10 = arith.constant dense<0.000000e+00> : vector<16x128xf32>
    %10 = tpu.matmul %7, %8, %cst_10 {dimension_numbers = #tpu.dot_dimension_numbers<[1], [0], [0], [1], [0, 0, 1, 1], [], []>} : vector<16x128xf32>, vector<128x128xf32>, vector<16x128xf32> -> vector<16x128xf32>
    %11 = vector.broadcast %9 : vector<1x128xf32> to vector<16x128xf32>
    %12 = arith.addf %10, %11 : vector<16x128xf32>
    %cst_11 = arith.constant 0.000000e+00 : f32
    %13 = vector.broadcast %cst_11 : f32 to vector<16x128xf32>
    %14 = arith.maximumf %12, %13 : vector<16x128xf32>
    %c0_12 = arith.constant 0 : index
    %c0_13 = arith.constant 0 : index
    %15 = vector.load %arg6[%c0_12, %c0_13] : memref<128x128xf32, #tpu.memory_space<vmem>>, vector<128x128xf32>
    %c0_14 = arith.constant 0 : index
    %c0_15 = arith.constant 0 : index
    %16 = vector.load %arg7[%c0_14, %c0_15] : memref<1x128xf32, #tpu.memory_space<vmem>>, vector<1x128xf32>
    %cst_16 = arith.constant dense<0.000000e+00> : vector<16x128xf32>
    %17 = tpu.matmul %14, %15, %cst_16 {dimension_numbers = #tpu.dot_dimension_numbers<[1], [0], [0], [1], [0, 0, 1, 1], [], []>} : vector<16x128xf32>, vector<128x128xf32>, vector<16x128xf32> -> vector<16x128xf32>
    %18 = vector.broadcast %16 : vector<1x128xf32> to vector<16x128xf32>
    %19 = arith.addf %17, %18 : vector<16x128xf32>
    %cst_17 = arith.constant 0.000000e+00 : f32
    %20 = vector.broadcast %cst_17 : f32 to vector<16x128xf32>
    %21 = arith.maximumf %19, %20 : vector<16x128xf32>
    %c0_18 = arith.constant 0 : index
    %c0_19 = arith.constant 0 : index
    %22 = vector.load %arg8[%c0_18, %c0_19] : memref<128x3xf32, #tpu.memory_space<vmem>>, vector<128x3xf32>
    %c0_20 = arith.constant 0 : index
    %c0_21 = arith.constant 0 : index
    %23 = vector.load %arg9[%c0_20, %c0_21] : memref<1x3xf32, #tpu.memory_space<vmem>>, vector<1x3xf32>
    %cst_22 = arith.constant dense<0.000000e+00> : vector<16x3xf32>
    %24 = tpu.matmul %21, %22, %cst_22 {dimension_numbers = #tpu.dot_dimension_numbers<[1], [0], [0], [1], [0, 0, 1, 1], [], []>} : vector<16x128xf32>, vector<128x3xf32>, vector<16x3xf32> -> vector<16x3xf32>
    %25 = vector.broadcast %23 : vector<1x3xf32> to vector<16x3xf32>
    %26 = arith.addf %24, %25 : vector<16x3xf32>
    %c0_23 = arith.constant 0 : index
    %c0_24 = arith.constant 0 : index
    %27 = vector.load %arg10[%c0_23, %c0_24] : memref<16x3xf32, #tpu.memory_space<vmem>>, vector<16x3xf32>
    tpu.vector_store %arg10[%c0_23, %c0_24], %26 {strides = array<i32>} : memref<16x3xf32, #tpu.memory_space<vmem>>, vector<16x3xf32>,
    return
  }
  func.func @transform_0(%arg0: i32) -> (i32, i32) {
    %c0_i32 = arith.constant 0 : i32
    %c0_i32_0 = arith.constant 0 : i32
    return %arg0, %c0_i32 : i32, i32
  }
  func.func @transform_1(%arg0: i32) -> (i32, i32) {
    %c0_i32 = arith.constant 0 : i32
    %c0_i32_0 = arith.constant 0 : i32
    %c0_i32_1 = arith.constant 0 : i32
    return %c0_i32, %c0_i32_0 : i32, i32
  }
  func.func @transform_2(%arg0: i32) -> (i32, i32) {
    %c0_i32 = arith.constant 0 : i32
    %c0_i32_0 = arith.constant 0 : i32
    %c0_i32_1 = arith.constant 0 : i32
    return %c0_i32, %c0_i32_0 : i32, i32
  }
  func.func @transform_3(%arg0: i32) -> (i32, i32) {
    %c0_i32 = arith.constant 0 : i32
    %c0_i32_0 = arith.constant 0 : i32
    %c0_i32_1 = arith.constant 0 : i32
    return %c0_i32, %c0_i32_0 : i32, i32
  }
  func.func @transform_4(%arg0: i32) -> (i32, i32) {
    %c0_i32 = arith.constant 0 : i32
    %c0_i32_0 = arith.constant 0 : i32
    %c0_i32_1 = arith.constant 0 : i32
    return %c0_i32, %c0_i32_0 : i32, i32
  }
  func.func @transform_5(%arg0: i32) -> (i32, i32) {
    %c0_i32 = arith.constant 0 : i32
    %c0_i32_0 = arith.constant 0 : i32
    %c0_i32_1 = arith.constant 0 : i32
    return %c0_i32, %c0_i32_0 : i32, i32
  }
  func.func @transform_6(%arg0: i32) -> (i32, i32) {
    %c0_i32 = arith.constant 0 : i32
    %c0_i32_0 = arith.constant 0 : i32
    %c0_i32_1 = arith.constant 0 : i32
    return %c0_i32, %c0_i32_0 : i32, i32
  }
  func.func @transform_7(%arg0: i32) -> (i32, i32) {
    %c0_i32 = arith.constant 0 : i32
    %c0_i32_0 = arith.constant 0 : i32
    %c0_i32_1 = arith.constant 0 : i32
    return %c0_i32, %c0_i32_0 : i32, i32
  }
  func.func @transform_8(%arg0: i32) -> (i32, i32) {
    %c0_i32 = arith.constant 0 : i32
    %c0_i32_0 = arith.constant 0 : i32
    %c0_i32_1 = arith.constant 0 : i32
    return %c0_i32, %c0_i32_0 : i32, i32
  }
  func.func @transform_9(%arg0: i32) -> (i32, i32) {
    %c0_i32 = arith.constant 0 : i32
    %c0_i32_0 = arith.constant 0 : i32
    return %arg0, %c0_i32 : i32, i32
  }
}

</mosaic_0001>

<bundles_post_ra>
// kernel: tpu_custom_call.1
= control target key start
LH: loop header
LB: loop body
LE: loop exit
PB: predicated region body
PF: predicated region fallthrough
CT: control target
= control target key end

     0   :  { %14 = vsyncpa [#allocation3], 0  ;;  %s746_s30 = smov [#allocation2]   ;;  %s938_s0 = inlined_call_operand.vmem [shape: f32[16,3], index: 0, kind: input, shape index: {}]   ;;  %s939_s1 = inlined_call_operand.vmem [shape: f32[3,128], index: 1, kind: input, shape index: {}]   ;;  %s940_s2 = inlined_call_operand.vmem [shape: f32[1,128], index: 2, kind: input, shape index: {}]   ;;  %s941_s3 = inlined_call_operand.vmem [shape: f32[128,128], index: 3, kind: input, shape index: {}]   ;;  %s942_s4 = inlined_call_operand.vmem [shape: f32[1,128], index: 4, kind: input, shape index: {}]   ;;  %s943_s5 = inlined_call_operand.hbm [shape: f32[128,128], index: 5, kind: input, shape index: {}]   ;;  %s944_s6 = inlined_call_operand.vmem [shape: f32[1,128], index: 6, kind: input, shape index: {}]   ;;  %s945_s7 = inlined_call_operand.vmem [shape: f32[128,3], index: 7, kind: input, shape index: {}]   ;;  %s946_s8 = inlined_call_operand.vmem [shape: f32[1,3], index: 8, kind: input, shape index: {}]   ;;  %s947_s9 = inlined_call_operand.vmem [shape: f32[16,3], index: 9, kind: output, shape index: {}]  }
   0x1   :  { %s30_s10 = sshll.u32 %s746_s30, 4  ;;  %s722_s13 = scalar_lea.hbm %s943_s5, 2048  ;;  %s31_s10 = int_to_ptr.vmem [resolvable:$true] %s30_s10 }
   0x2   :  { %p723_p0 = scmp.ne.s32.totalorder %s943_s5, %s722_s13  ;;  %p726_p1 = scmp.lt.u32.totalorder %s722_s13, %s943_s5 }
   0x4   :  { %p728_p2 = pnand %p726_p1, %p723_p0 }
   0x6   :  { %731 = shalt.err (!%p728_p2)
}
   0x7   :  { %s732_s18 = scalar_lea.vmem %s31_s10, 2048  ;;  %p737_p4 = scmp.lt.s32.totalorder %s31_s10, %s31_s10 }
   0x8   :  { %p733_p3 = scmp.ne.s32.totalorder %s31_s10, %s732_s18  ;;  %p738_p5 = scmp.lt.s32.totalorder %s732_s18, %s732_s18 }
   0xa   :  { %p739_p6 = por %p738_p5, %p737_p4 }
   0xc   :  { %p740_p7 = pnand %p739_p6, %p733_p3 }
   0xe   :  { %743 = shalt.err (!%p740_p7)
}
   0xf   :  { %s747_s19 = smov 128   ;;  %s748_s20 = smov 8  }
  0x10   :  { %36 = dma.hbm_to_vmem [thread:$0]  %s943_s5, 2048, %s31_s10, [#allocation3], %s747_s19, %s747_s19, %s748_s20  }
  0x11   :  { %744 = dma.done.wait [#allocation3], 2048  }
  0x12   :  { %745 = vsyncadd [#allocation3], 4294965248  ;;  %vm63_vm0 = vcmask 1042432   ;;  %vm56_vm1 = vcmask 23552   ;;  %v48_v0 = vld [vmem:[%s939_s1] sm:$0x7] }
  0x13   :  { %v46_v1 = vld [vmem:[%s938_s0] sm:$0xff]  ;;  %v47_v2 = vld [vmem:[%s938_s0 + $0x8] sm:$0xff]  ;;  %513 = vmatprep.subr.msk.mxu0 %vm63_vm0, %v48_v0  ;;  %v146_v5 = vld [vmem:[%s941_s3 + $0x10] sm:$0xff] }
  0x14   :  { %515 = vmatprep.mubr.msk.f32.mxu0 %vm56_vm1, %v46_v1  ;;  %v144_v3 = vld [vmem:[%s941_s3] sm:$0xff]  ;;  %v145_v4 = vld [vmem:[%s941_s3 + $0x8] sm:$0xff]  ;;  %514 = vmatpush3.msk.msra.mxu0 %vm63_vm0, %v48_v0  ;;  %v147_v7 = vld [vmem:[%s941_s3 + $0x18] sm:$0xff] }
  0x15   :  { %v623_v6 = vpack.c.bf16 %v145_v4, %v144_v3  ;;  %516 = vmatmul.mubr.msk.f32.vlgmr.msra.gmra.mrb[0].mxu0 %vm56_vm1, %v47_v2  ;;  %v627_v8 = vpack.c.bf16 %v147_v7, %v146_v5  ;;  %v148_v9 = vld [vmem:[%s941_s3 + $0x20] sm:$0xff]  ;;  %v149_v10 = vld [vmem:[%s941_s3 + $0x28] sm:$0xff]  ;;  %v150_v12 = vld [vmem:[%s941_s3 + $0x30] sm:$0xff] }
  0x16   :  { %v631_v11 = vpack.c.bf16 %v149_v10, %v148_v9  ;;  %v151_v13 = vld [vmem:[%s941_s3 + $0x38] sm:$0xff]  ;;  %v152_v15 = vld [vmem:[%s941_s3 + $0x40] sm:$0xff]  ;;  %v153_v16 = vld [vmem:[%s941_s3 + $0x48] sm:$0xff] }
  0x17   :  { %624 = vmatprep.subr.bf16.mxu1 %v623_v6  ;;  %v635_v14 = vpack.c.bf16 %v151_v13, %v150_v12  ;;  %v639_v17 = vpack.c.bf16 %v153_v16, %v152_v15  ;;  %v154_v18 = vld [vmem:[%s941_s3 + $0x50] sm:$0xff]  ;;  %v155_v19 = vld [vmem:[%s941_s3 + $0x58] sm:$0xff]  ;;  %v156_v21 = vld [vmem:[%s941_s3 + $0x60] sm:$0xff] }
  0x18   :  { %626 = vmatpush3.bf16.msra.mxu1 %v623_v6  ;;  %v643_v20 = vpack.c.bf16 %v155_v19, %v154_v18  ;;  %v157_v22 = vld [vmem:[%s941_s3 + $0x68] sm:$0xff]  ;;  %v158_v24 = vld [vmem:[%s941_s3 + $0x70] sm:$0xff]  ;;  %v159_v25 = vld [vmem:[%s941_s3 + $0x78] sm:$0xff] }
  0x19   :  { %628 = vmatprep.subr.bf16.mxu1 %v627_v8  ;;  %v647_v23 = vpack.c.bf16 %v157_v22, %v156_v21  ;;  %v651_v26 = vpack.c.bf16 %v159_v25, %v158_v24  ;;  %v244_v27 = vld [vmem:[#allocation2] sm:$0xff]  ;;  %v245_v28 = vld [vmem:[#allocation2 + $0x8] sm:$0xff]  ;;  %v246_v29 = vld [vmem:[#allocation2 + $0x10] sm:$0xff] }
  0x1a   :  { %v655_v30 = vpack.c.bf16 %v245_v28, %v244_v27  ;;  %v247_v31 = vld [vmem:[#allocation2 + $0x18] sm:$0xff]  ;;  %v248_v33 = vld [vmem:[#allocation2 + $0x20] sm:$0xff]  ;;  %v249_v34 = vld [vmem:[#allocation2 + $0x28] sm:$0xff] }
  0x1b   :  { %v659_v32 = vpack.c.bf16 %v247_v31, %v246_v29  ;;  %v663_v35 = vpack.c.bf16 %v249_v34, %v248_v33  ;;  %v250_v36 = vld [vmem:[#allocation2 + $0x30] sm:$0xff]  ;;  %v251_v37 = vld [vmem:[#allocation2 + $0x38] sm:$0xff]  ;;  %v252_v39 = vld [vmem:[#allocation2 + $0x40] sm:$0xff] }
  0x1c   :  { %630 = vmatpush3.bf16.msra.mxu1 %v627_v8  ;;  %656 = vmatprep.subr.bf16.mxu0 %v655_v30  ;;  %v667_v38 = vpack.c.bf16 %v251_v37, %v250_v36  ;;  %v253_v40 = vld [vmem:[#allocation2 + $0x48] sm:$0xff]  ;;  %v254_v42 = vld [vmem:[#allocation2 + $0x50] sm:$0xff]  ;;  %v255_v43 = vld [vmem:[#allocation2 + $0x58] sm:$0xff] }
  0x1d   :  { %632 = vmatprep.subr.bf16.mxu1 %v631_v11  ;;  %658 = vmatpush3.bf16.msra.mxu0 %v655_v30  ;;  %v671_v41 = vpack.c.bf16 %v253_v40, %v252_v39  ;;  %v675_v44 = vpack.c.bf16 %v255_v43, %v254_v42  ;;  %v256_v45 = vld [vmem:[#allocation2 + $0x60] sm:$0xff]  ;;  %v257_v46 = vld [vmem:[#allocation2 + $0x68] sm:$0xff]  ;;  %v258_v55 = vld [vmem:[#allocation2 + $0x70] sm:$0xff] }
  0x1e   :  { %660 = vmatprep.subr.bf16.mxu0 %v659_v32  ;;  %v679_v47 = vpack.c.bf16 %v257_v46, %v256_v45  ;;  %v449_v48 = vld [vmem:[%s940_s2] ss:$0 sm:$0xff]  ;;  %v259_v56 = vld [vmem:[#allocation2 + $0x78] sm:$0xff]  ;;  %v345_v59 = vld [vmem:[%s945_s7 + $0x8] sm:$0xff] }
  0x1f   :  { %v683_v57 = vpack.c.bf16 %v259_v56, %v258_v55  ;;  %v344_v58 = vld [vmem:[%s945_s7] sm:$0xff]  ;;  %v346_v60 = vld [vmem:[%s945_s7 + $0x10] sm:$0xff]  ;;  %v347_v62 = vld [vmem:[%s945_s7 + $0x18] sm:$0xff] }
  0x20   :  { %634 = vmatpush3.bf16.msra.mxu1 %v631_v11  ;;  %v687_v61 = vpack.c.bf16 %v345_v59, %v344_v58  ;;  %v691_v63 = vpack.c.bf16 %v347_v62, %v346_v60  ;;  %v348_v0 = vld [vmem:[%s945_s7 + $0x20] sm:$0xff]  ;;  %v349_v1 = vld [vmem:[%s945_s7 + $0x28] sm:$0xff]  ;;  %v350_v3 = vld [vmem:[%s945_s7 + $0x30] sm:$0xff] }
  0x21   :  { %636 = vmatprep.subr.bf16.mxu1 %v635_v14  ;;  %662 = vmatpush3.bf16.msra.mxu0 %v659_v32  ;;  %v695_v2 = vpack.c.bf16 %v349_v1, %v348_v0  ;;  %v351_v4 = vld [vmem:[%s945_s7 + $0x38] sm:$0xff]  ;;  %v352_v6 = vld [vmem:[%s945_s7 + $0x40] sm:$0xff]  ;;  %v353_v7 = vld [vmem:[%s945_s7 + $0x48] sm:$0xff] }
  0x22   :  { %664 = vmatprep.subr.bf16.mxu0 %v663_v35  ;;  %v699_v5 = vpack.c.bf16 %v351_v4, %v350_v3  ;;  %v703_v8 = vpack.c.bf16 %v353_v7, %v352_v6  ;;  %v354_v9 = vld [vmem:[%s945_s7 + $0x50] sm:$0xff]  ;;  %v355_v10 = vld [vmem:[%s945_s7 + $0x58] sm:$0xff]  ;;  %v356_v12 = vld [vmem:[%s945_s7 + $0x60] sm:$0xff] }
  0x23   :  { %v707_v11 = vpack.c.bf16 %v355_v10, %v354_v9  ;;  %v357_v13 = vld [vmem:[%s945_s7 + $0x68] sm:$0xff]  ;;  %v453_v15 = vld [vmem:[%s942_s4] ss:$0 sm:$0xff]  ;;  %v358_v22 = vld [vmem:[%s945_s7 + $0x70] sm:$0xff] }
  0x24   :  { %638 = vmatpush3.bf16.msra.mxu1 %v635_v14  ;;  %v711_v14 = vpack.c.bf16 %v357_v13, %v356_v12  ;;  %v454_v25 = vld [vmem:[%s944_s6] ss:$0 sm:$0xff] }
  0x25   :  { %640 = vmatprep.subr.bf16.mxu1 %v639_v17  ;;  %666 = vmatpush3.bf16.msra.mxu0 %v663_v35  ;;  %v455_v32 = vld [vmem:[%s946_s8] ss:$0 sm:$0xff] }
  0x26   :  { %668 = vmatprep.subr.bf16.mxu0 %v667_v38 }
  0x28   :  { %642 = vmatpush3.bf16.msra.mxu1 %v639_v17 }
  0x29   :  { %644 = vmatprep.subr.bf16.mxu1 %v643_v20  ;;  %670 = vmatpush3.bf16.msra.mxu0 %v667_v38 }
  0x2a   :  { %672 = vmatprep.subr.bf16.mxu0 %v671_v41 }
  0x2c   :  { %646 = vmatpush3.bf16.msra.mxu1 %v643_v20 }
  0x2d   :  { %648 = vmatprep.subr.bf16.mxu1 %v647_v23  ;;  %674 = vmatpush3.bf16.msra.mxu0 %v671_v41 }
  0x2e   :  { %676 = vmatprep.subr.bf16.mxu0 %v675_v44 }
  0x30   :  { %650 = vmatpush3.bf16.msra.mxu1 %v647_v23  ;;  %v359_v23 = vld [vmem:[%s945_s7 + $0x78] sm:$0xff] }
  0x31   :  { %652 = vmatprep.subr.bf16.mxu1 %v651_v26  ;;  %678 = vmatpush3.bf16.msra.mxu0 %v675_v44  ;;  %v715_v24 = vpack.c.bf16 %v359_v23, %v358_v22 }
  0x32   :  { %680 = vmatprep.subr.bf16.mxu0 %v679_v47 }
  0x34   :  { %654 = vmatpush3.bf16.msra.mxu1 %v651_v26 }
  0x35   :  { %682 = vmatpush3.bf16.msra.mxu0 %v679_v47  ;;  %688 = vmatprep.subr.bf16.mxu1 %v687_v61 }
  0x36   :  { %684 = vmatprep.subr.bf16.mxu0 %v683_v57 }
  0x39   :  { %686 = vmatpush3.bf16.msra.mxu0 %v683_v57 }
  0xe8   :  { %v517_v49 = vpop.f32.mrb[0].mxu0 }
  0xe9   :  { %v139_v50 = vadd.f32 %v517_v49, %v449_v48  ;;  %v133_v51 = vpop.f32.mrb[1].mxu0 }
  0xea   :  { %v134_v52 = vadd.f32 %v449_v48, %v133_v51 }
  0xeb   :  { %v143_v54 = vmax.f32 %v139_v50, 0.0 }
  0xec   :  { %v142_v53 = vmax.f32 %v134_v52, 0.0 }
  0xee   :  { %550 = vmatprep.mubr.f32.mxu1 %v142_v53 }
  0xef   :  { %551 = vmatmul.mubr.f32.vlgmr.msra.gmra.mrb[0].mxu1 %v143_v54 }
  0xf0   :  { %690 = vmatpush3.bf16.msra.mxu1 %v687_v61 }
  0xf1   :  { %692 = vmatprep.subr.bf16.mxu1 %v691_v63 }
  0xf4   :  { %694 = vmatpush3.bf16.msra.mxu1 %v691_v63 }
  0xf5   :  { %696 = vmatprep.subr.bf16.mxu1 %v695_v2 }
  0xf8   :  { %698 = vmatpush3.bf16.msra.mxu1 %v695_v2 }
  0xf9   :  { %700 = vmatprep.subr.bf16.mxu1 %v699_v5 }
  0xfc   :  { %702 = vmatpush3.bf16.msra.mxu1 %v699_v5 }
  0xfd   :  { %704 = vmatprep.subr.bf16.mxu1 %v703_v8 }
 0x100   :  { %706 = vmatpush3.bf16.msra.mxu1 %v703_v8 }
 0x101   :  { %708 = vmatprep.subr.bf16.mxu1 %v707_v11 }
 0x104   :  { %710 = vmatpush3.bf16.msra.mxu1 %v707_v11 }
 0x105   :  { %712 = vmatprep.subr.bf16.mxu1 %v711_v14 }
 0x108   :  { %714 = vmatpush3.bf16.msra.mxu1 %v711_v14 }
 0x109   :  { %716 = vmatprep.subr.bf16.mxu1 %v715_v24 }
 0x10c   :  { %718 = vmatpush3.bf16.msra.mxu1 %v715_v24 }
 0x1c2   :  { %v552_v16 = vpop.f32.mrb[0].mxu1 }
 0x1c3   :  { %v239_v17 = vadd.f32 %v552_v16, %v453_v15  ;;  %v233_v18 = vpop.f32.mrb[1].mxu1 }
 0x1c4   :  { %v234_v19 = vadd.f32 %v453_v15, %v233_v18 }
 0x1c5   :  { %v243_v21 = vmax.f32 %v239_v17, 0.0 }
 0x1c6   :  { %v242_v20 = vmax.f32 %v234_v19, 0.0 }
 0x1c8   :  { %585 = vmatprep.mubr.f32.mxu0 %v242_v20 }
 0x1c9   :  { %586 = vmatmul.mubr.f32.vlgmr.msra.gmra.mrb[2].mxu0 %v243_v21 }
 0x29c   :  { %v587_v26 = vpop.f32.mrb[2].mxu0 }
 0x29d   :  { %v339_v27 = vadd.f32 %v587_v26, %v454_v25  ;;  %v333_v28 = vpop.f32.mrb[3].mxu0 }
 0x29e   :  { %v334_v29 = vadd.f32 %v454_v25, %v333_v28 }
 0x29f   :  { %v343_v31 = vmax.f32 %v339_v27, 0.0 }
 0x2a0   :  { %v342_v30 = vmax.f32 %v334_v29, 0.0 }
 0x2a2   :  { %620 = vmatprep.mubr.f32.mxu1 %v342_v30 }
 0x2a3   :  { %621 = vmatmul.mubr.f32.vlgmr.msra.gmra.mrb[2].mxu1 %v343_v31 }
 0x376   :  { %v622_v33 = vpop.f32.mrb[2].mxu1 }
 0x377   :  { %v439_v34 = vadd.f32 %v622_v33, %v455_v32  ;;  %v433_v35 = vpop.f32.mrb[3].mxu1 }
 0x378   :  { %v434_v36 = vadd.f32 %v455_v32, %v433_v35 }
 0x379   :  { %443 = vst.msk [vmem:[%s947_s9 + $0x8] sm:$0xff] %vm56_vm1, %v439_v34 }
 0x37a   :  { %442 = vst.msk [vmem:[%s947_s9] sm:$0xff] %vm56_vm1, %v434_v36 }
 0x37b   :  { %448 = vsyncpa [#allocation3], 1 }

</bundles_post_ra>
